<compile_context>
chip_gen: v5e
topology: v5e:2x2
jax: 0.10.0
libtpu: 0.0.40
codegen_flags: <defaults>
</compile_context>

<pallas_src>
import numpy as np
import jax
import jax.numpy as jnp
from jax import lax
from jax.experimental import pallas as pl
from jax.experimental.pallas import tpu as pltpu


def _round_up(x, m):
    return ((x + m - 1) // m) * m


def _pick_tile(dim_p, target):
    """Largest multiple of 128 <= target that divides dim_p (dim_p is a 128-multiple)."""
    t = min(target, dim_p)
    t -= t % 128
    t = max(t, 128)
    while dim_p % t != 0:
        t -= 128
    return t


def _pick_tn(ne_p, target):
    # Cap TN at ne_p/2 when possible so the "parallel" N axis has >= 2 tiles
    # (lets v7x shard the output axis across its 2 TensorCores).
    cap = ne_p // 2 if ne_p >= 256 else ne_p
    return _pick_tile(ne_p, min(target, cap))


def eirnn_cell_kernel(x_ref, h_ref, uex_ref, uix_ref, uei_ref,
                      wex_ref, wix_ref, wei_ref, b_ref, out_ref, hi_ref):
    k = pl.program_id(1)

    # Contract dim 1 of both operands (feature axes) — no physical transpose.
    dn = (((1,), (1,)), ((), ()))

    @pl.when(k == 0)
    def _init():
        # Input path + bias, once per output N-tile:
        #   x @ Uex^T - (x @ Uix^T) @ Uei^T + b
        xu = lax.dot_general(x_ref[...], uex_ref[...], dn,
                             preferred_element_type=jnp.float32)       # (B, TN) f32
        xi = lax.dot_general(x_ref[...], uix_ref[...], dn,
                             preferred_element_type=jnp.float32)       # (B, ni) f32
        xu = xu - lax.dot_general(xi, uei_ref[...], dn,
                                  preferred_element_type=jnp.float32)  # (B, TN)
        out_ref[...] = xu + b_ref[...]
        hi_ref[...] = jnp.zeros_like(hi_ref)

    # Recurrent path, accumulated over K-tiles of the hidden dim.
    # Main stream:   out += h_k @ Wex[n, k]^T        (f32-resident output block)
    # Low-rank stat: hi  += h_k @ Wix[:, k]^T        (tiny (B, ni) scratch)
    out_ref[...] += lax.dot_general(h_ref[...], wex_ref[...], dn,
                                    preferred_element_type=jnp.float32)
    hi_ref[...] += lax.dot_general(h_ref[...], wix_ref[...], dn,
                                   preferred_element_type=jnp.float32)

    @pl.when(k == pl.num_programs(1) - 1)
    def _finalize():
        # Apply the hoisted low-rank recurrent correction once per N-tile.
        out_ref[...] -= lax.dot_general(hi_ref[...], wei_ref[...], dn,
                                        preferred_element_type=jnp.float32)
        # identity nonlinearity — nothing else to do.


def eirnn_cell_forward(x, h, params, *, tn_target=512, tk_target=1024):
    """x: (B, n_input) f32, h: (B, ne) f32 (batch-major hidden state).
    Returns (B, ne) f32 — identical to EiRNNCell.forward(x) (identity nonlinearity)."""
    B, n_input = x.shape
    ne = params["Wex"].shape[0]
    ni_i2h = params["Uei"].shape[1]
    ni_h2h = params["Wei"].shape[1]

    # ---- pad to bf16-friendly shapes (zero pad => exact result after slice-back) ----
    B_p = _round_up(B, 16)                 # bf16 sublane packing is (16, 128)
    ne_p = _round_up(ne, 128)
    nin_p = _round_up(n_input, 128)
    ni_i_p = _round_up(max(ni_i2h, 1), 16)
    ni_h_p = _round_up(max(ni_h2h, 1), 16)

    def pad2(a, r, c, dtype):
        a = jnp.pad(a, ((0, r - a.shape[0]), (0, c - a.shape[1])))
        return a.astype(dtype)

    bf16 = jnp.bfloat16
    f32 = jnp.float32

    # Large streams in bf16 (f32 MXU accumulation); tiny low-rank factors + bias in f32.
    x_p = pad2(x, B_p, nin_p, bf16)
    h_p = pad2(h, B_p, ne_p, bf16)
    uex_p = pad2(params["Uex"], ne_p, nin_p, bf16)
    uix_p = pad2(params["Uix"], ni_i_p, nin_p, bf16)
    uei_p = pad2(params["Uei"], ne_p, ni_i_p, f32)
    wex_p = pad2(params["Wex"], ne_p, ne_p, bf16)
    wix_p = pad2(params["Wix"], ni_h_p, ne_p, bf16)
    wei_p = pad2(params["Wei"], ne_p, ni_h_p, f32)
    b_p = pad2(params["bias_row"], 1, ne_p, f32)

    # ---- tiling: N = output ne tiles, K = recurrent contraction tiles ----
    TN = _pick_tn(ne_p, tn_target)
    TK = _pick_tile(ne_p, tk_target)
    nt = ne_p // TN
    kt = ne_p // TK

    flops = 2 * B_p * (nin_p * ne_p + nin_p * ni_i_p + ni_i_p * ne_p
                       + ne_p * ne_p + ne_p * ni_h_p + ni_h_p * ne_p)
    bytes_accessed = (2 * (x_p.size + h_p.size + uex_p.size + uix_p.size
                           + wex_p.size + wix_p.size)
                      + 4 * (uei_p.size + wei_p.size + b_p.size + B_p * ne_p))

    out_p = pl.pallas_call(
        eirnn_cell_kernel,
        out_shape=jax.ShapeDtypeStruct((B_p, ne_p), jnp.float32),
        grid_spec=pltpu.PrefetchScalarGridSpec(
            num_scalar_prefetch=0,
            grid=(nt, kt),
            in_specs=[
                pl.BlockSpec((B_p, nin_p),    lambda n, k: (0, 0)),   # x      (bf16)
                pl.BlockSpec((B_p, TK),       lambda n, k: (0, k)),   # h      (bf16)
                pl.BlockSpec((TN, nin_p),     lambda n, k: (n, 0)),   # Uex    (bf16)
                pl.BlockSpec((ni_i_p, nin_p), lambda n, k: (0, 0)),   # Uix    (bf16)
                pl.BlockSpec((TN, ni_i_p),    lambda n, k: (n, 0)),   # Uei    (f32)
                pl.BlockSpec((TN, TK),        lambda n, k: (n, k)),   # Wex    (bf16, dominant stream)
                pl.BlockSpec((ni_h_p, TK),    lambda n, k: (0, k)),   # Wix    (bf16)
                pl.BlockSpec((TN, ni_h_p),    lambda n, k: (n, 0)),   # Wei    (f32)
                pl.BlockSpec((1, TN),         lambda n, k: (0, n)),   # bias row (f32)
            ],
            out_specs=pl.BlockSpec((B_p, TN), lambda n, k: (0, n)),   # resident across k
            scratch_shapes=[pltpu.VMEM((B_p, ni_h_p), jnp.float32)],  # hi accumulator
        ),
        compiler_params=pltpu.CompilerParams(
            dimension_semantics=("parallel", "arbitrary"),
        ),
        cost_estimate=pl.CostEstimate(flops=flops, transcendentals=0,
                                      bytes_accessed=bytes_accessed),
    )(x_p, h_p, uex_p, uix_p, uei_p, wex_p, wix_p, wei_p, b_p)

    return out_p[:B, :ne]


def init_eirnn_params(n_input, ne, ni_i2h, ni_h2h, numerator=1.0 / 3.0, seed=0):
    """Deterministic replication of EiRNNCell.init_weights (lognormal branch)."""
    rng = np.random.RandomState(seed)

    def calc_ln_mu_sigma(mean, var):
        mu_ln = np.log(mean ** 2 / np.sqrt(mean ** 2 + var))
        sigma_ln = np.sqrt(np.log(1 + var / mean ** 2))
        return mu_ln, sigma_ln

    n_hidden = ne
    target_std_wex = np.sqrt(numerator * ne / (n_hidden * (ne - 1)))
    mu, sigma = calc_ln_mu_sigma(target_std_wex, target_std_wex ** 2)
    Wex = rng.lognormal(mu, sigma, size=(ne, ne))
    Wei = rng.lognormal(mu, sigma, size=(ne, ni_h2h))
    Wei /= Wei.sum(axis=1, keepdims=True)
    Wix = np.ones((ni_h2h, 1)) * Wex.mean(axis=0, keepdims=True)

    target_std_uex = np.sqrt(numerator * ne / (n_input * (ne - 1)))
    mu, sigma = calc_ln_mu_sigma(target_std_uex, target_std_uex ** 2)
    Uex = rng.lognormal(mu, sigma, size=(ne, n_input))
    Uei = rng.lognormal(mu, sigma, size=(ne, ni_i2h))
    Uei /= Uei.sum(axis=1, keepdims=True)
    Uix = np.ones((ni_i2h, 1)) * Uex.mean(axis=0, keepdims=True)

    bias = np.zeros((ne, 1), dtype=np.float32)   # exponentiated=False branch
    h0 = np.zeros((ne, 1), dtype=np.float32)

    to_f32 = lambda a: jnp.asarray(a, dtype=jnp.float32)
    return {
        "Uex": to_f32(Uex), "Uix": to_f32(Uix), "Uei": to_f32(Uei),
        "Wex": to_f32(Wex), "Wix": to_f32(Wix), "Wei": to_f32(Wei),
        "bias_row": to_f32(bias.T),   # (1, ne) row layout for batch-major kernel
        "h0": to_f32(h0),
    }


def eirnn_cell_reference(x, h, params):
    """Pure-JAX f32 reference mirroring the PyTorch forward."""
    U = params["Uex"] - params["Uei"] @ params["Uix"]
    W = params["Wex"] - params["Wei"] @ params["Wix"]
    z = U @ x.T + W @ h.T + params["bias_row"].T   # (ne, B)
    return z.T                                      # (B, ne)


if __name__ == "__main__":
    # Small shapes consistent with the module defaults (ni = int(0.1 * ne)).
    batch, n_input, ne = 8, 16, 32
    ni_i2h = int(ne * 0.1)   # 3
    ni_h2h = int(ne * 0.1)   # 3

    params = init_eirnn_params(n_input, ne, ni_i2h, ni_h2h, seed=0)

    key = jax.random.PRNGKey(0)
    x = jax.random.normal(key, (batch, n_input), dtype=jnp.float32)

    # reset_hidden: h = h0.repeat(1, batch) -> batch-major (batch, ne) of zeros.
    h = jnp.tile(params["h0"].T, (batch, 1))

    out = eirnn_cell_forward(x, h, params)
    out = jax.block_until_ready(out)

    ref = eirnn_cell_reference(x, h, params)
    # Tolerance loosened vs. the pure-f32 kernel: the large streams are bf16
    # (f32 accumulation), per the performance review.
    np.testing.assert_allclose(np.asarray(out), np.asarray(ref),
                               rtol=2e-2, atol=2e-2)

    print("KERNEL_OK")
</pallas_src>

<mosaic_0001>
module attributes {stable_mosaic.version = 11 : i64} {
  func.func @eirnn_cell_kernel(%arg0: i32, %arg1: i32, %arg2: memref<16x128xbf16, #tpu.memory_space<vmem>>, %arg3: memref<16x128xbf16, #tpu.memory_space<vmem>>, %arg4: memref<128x128xbf16, #tpu.memory_space<vmem>>, %arg5: memref<16x128xbf16, #tpu.memory_space<vmem>>, %arg6: memref<128x16xf32, #tpu.memory_space<vmem>>, %arg7: memref<128x128xbf16, #tpu.memory_space<vmem>>, %arg8: memref<16x128xbf16, #tpu.memory_space<vmem>>, %arg9: memref<128x16xf32, #tpu.memory_space<vmem>>, %arg10: memref<1x128xf32, #tpu.memory_space<vmem>>, %arg11: memref<16x128xf32, #tpu.memory_space<vmem>>, %arg12: memref<16x16xf32, #tpu.memory_space<vmem>>) attributes {dimension_semantics = [#tpu.dimension_semantics<parallel>, #tpu.dimension_semantics<arbitrary>], iteration_bounds = array<i64: 1, 1>, scalar_prefetch = 0 : i64, scratch_operands = 1 : i64, tpu.core_type = #tpu.core_type<tc>, window_params = [{pipeline_mode = #tpu.pipeline_mode<synchronous>, transform_indices = @transform_0, window_bounds = array<i64: 16, 128>}, {transform_indices = @transform_1, window_bounds = array<i64: 16, 128>}, {transform_indices = @transform_2, window_bounds = array<i64: 128, 128>}, {pipeline_mode = #tpu.pipeline_mode<synchronous>, transform_indices = @transform_3, window_bounds = array<i64: 16, 128>}, {transform_indices = @transform_4, window_bounds = array<i64: 128, 16>}, {transform_indices = @transform_5, window_bounds = array<i64: 128, 128>}, {transform_indices = @transform_6, window_bounds = array<i64: 16, 128>}, {transform_indices = @transform_7, window_bounds = array<i64: 128, 16>}, {transform_indices = @transform_8, window_bounds = array<i64: 1, 128>}, {transform_indices = @transform_9, window_bounds = array<i64: 16, 128>}]} {
    %c0_i32 = arith.constant 0 : i32
    %0 = arith.cmpi eq, %arg1, %c0_i32 : i32
    %1 = arith.extui %0 : i1 to i32
    %c0_i32_0 = arith.constant 0 : i32
    %2 = arith.cmpi ne, %1, %c0_i32_0 : i32
    scf.if %2 {
      %c0_19 = arith.constant 0 : index
      %c0_20 = arith.constant 0 : index
      %18 = vector.load %arg2[%c0_19, %c0_20] : memref<16x128xbf16, #tpu.memory_space<vmem>>, vector<16x128xbf16>
      %c0_21 = arith.constant 0 : index
      %c0_22 = arith.constant 0 : index
      %19 = vector.load %arg4[%c0_21, %c0_22] : memref<128x128xbf16, #tpu.memory_space<vmem>>, vector<128x128xbf16>
      %cst_23 = arith.constant dense<0.000000e+00> : vector<16x128xf32>
      %20 = tpu.matmul %18, %19, %cst_23 {dimension_numbers = #tpu.dot_dimension_numbers<[1], [1], [0], [0], [0, 0, 1, 0], [], []>} : vector<16x128xbf16>, vector<128x128xbf16>, vector<16x128xf32> -> vector<16x128xf32>
      %c0_24 = arith.constant 0 : index
      %c0_25 = arith.constant 0 : index
      %21 = vector.load %arg2[%c0_24, %c0_25] : memref<16x128xbf16, #tpu.memory_space<vmem>>, vector<16x128xbf16>
      %c0_26 = arith.constant 0 : index
      %c0_27 = arith.constant 0 : index
      %22 = vector.load %arg5[%c0_26, %c0_27] : memref<16x128xbf16, #tpu.memory_space<vmem>>, vector<16x128xbf16>
      %cst_28 = arith.constant dense<0.000000e+00> : vector<16x16xf32>
      %23 = tpu.matmul %21, %22, %cst_28 {dimension_numbers = #tpu.dot_dimension_numbers<[1], [1], [0], [0], [0, 0, 1, 0], [], []>} : vector<16x128xbf16>, vector<16x128xbf16>, vector<16x16xf32> -> vector<16x16xf32>
      %c0_29 = arith.constant 0 : index
      %c0_30 = arith.constant 0 : index
      %24 = vector.load %arg6[%c0_29, %c0_30] : memref<128x16xf32, #tpu.memory_space<vmem>>, vector<128x16xf32>
      %cst_31 = arith.constant dense<0.000000e+00> : vector<16x128xf32>
      %25 = tpu.matmul %23, %24, %cst_31 {dimension_numbers = #tpu.dot_dimension_numbers<[1], [1], [0], [0], [0, 0, 1, 0], [], []>} : vector<16x16xf32>, vector<128x16xf32>, vector<16x128xf32> -> vector<16x128xf32>
      %26 = arith.subf %20, %25 : vector<16x128xf32>
      %c0_32 = arith.constant 0 : index
      %c0_33 = arith.constant 0 : index
      %27 = vector.load %arg10[%c0_32, %c0_33] : memref<1x128xf32, #tpu.memory_space<vmem>>, vector<1x128xf32>
      %28 = vector.broadcast %27 : vector<1x128xf32> to vector<16x128xf32>
      %29 = arith.addf %26, %28 : vector<16x128xf32>
      %c0_34 = arith.constant 0 : index
      %c0_35 = arith.constant 0 : index
      %30 = vector.load %arg11[%c0_34, %c0_35] : memref<16x128xf32, #tpu.memory_space<vmem>>, vector<16x128xf32>
      tpu.vector_store %arg11[%c0_34, %c0_35], %29 {strides = array<i32>} : memref<16x128xf32, #tpu.memory_space<vmem>>, vector<16x128xf32>,
      %cst_36 = arith.constant 0.000000e+00 : f32
      %31 = vector.broadcast %cst_36 : f32 to vector<16x16xf32>
      %c0_37 = arith.constant 0 : index
      %c0_38 = arith.constant 0 : index
      %32 = vector.load %arg12[%c0_37, %c0_38] : memref<16x16xf32, #tpu.memory_space<vmem>>, vector<16x16xf32>
      tpu.vector_store %arg12[%c0_37, %c0_38], %31 {strides = array<i32>} : memref<16x16xf32, #tpu.memory_space<vmem>>, vector<16x16xf32>,
    } else {
    }
    %c0 = arith.constant 0 : index
    %c0_1 = arith.constant 0 : index
    %3 = vector.load %arg11[%c0, %c0_1] : memref<16x128xf32, #tpu.memory_space<vmem>>, vector<16x128xf32>
    %c0_2 = arith.constant 0 : index
    %c0_3 = arith.constant 0 : index
    %4 = vector.load %arg3[%c0_2, %c0_3] : memref<16x128xbf16, #tpu.memory_space<vmem>>, vector<16x128xbf16>
    %c0_4 = arith.constant 0 : index
    %c0_5 = arith.constant 0 : index
    %5 = vector.load %arg7[%c0_4, %c0_5] : memref<128x128xbf16, #tpu.memory_space<vmem>>, vector<128x128xbf16>
    %cst = arith.constant dense<0.000000e+00> : vector<16x128xf32>
    %6 = tpu.matmul %4, %5, %cst {dimension_numbers = #tpu.dot_dimension_numbers<[1], [1], [0], [0], [0, 0, 1, 0], [], []>} : vector<16x128xbf16>, vector<128x128xbf16>, vector<16x128xf32> -> vector<16x128xf32>
    %7 = arith.addf %3, %6 : vector<16x128xf32>
    %c0_6 = arith.constant 0 : index
    %c0_7 = arith.constant 0 : index
    %8 = vector.load %arg11[%c0_6, %c0_7] : memref<16x128xf32, #tpu.memory_space<vmem>>, vector<16x128xf32>
    tpu.vector_store %arg11[%c0_6, %c0_7], %7 {strides = array<i32>} : memref<16x128xf32, #tpu.memory_space<vmem>>, vector<16x128xf32>,
    %c0_8 = arith.constant 0 : index
    %c0_9 = arith.constant 0 : index
    %9 = vector.load %arg12[%c0_8, %c0_9] : memref<16x16xf32, #tpu.memory_space<vmem>>, vector<16x16xf32>
    %c0_10 = arith.constant 0 : index
    %c0_11 = arith.constant 0 : index
    %10 = vector.load %arg3[%c0_10, %c0_11] : memref<16x128xbf16, #tpu.memory_space<vmem>>, vector<16x128xbf16>
    %c0_12 = arith.constant 0 : index
    %c0_13 = arith.constant 0 : index
    %11 = vector.load %arg8[%c0_12, %c0_13] : memref<16x128xbf16, #tpu.memory_space<vmem>>, vector<16x128xbf16>
    %cst_14 = arith.constant dense<0.000000e+00> : vector<16x16xf32>
    %12 = tpu.matmul %10, %11, %cst_14 {dimension_numbers = #tpu.dot_dimension_numbers<[1], [1], [0], [0], [0, 0, 1, 0], [], []>} : vector<16x128xbf16>, vector<16x128xbf16>, vector<16x16xf32> -> vector<16x16xf32>
    %13 = arith.addf %9, %12 : vector<16x16xf32>
    %c0_15 = arith.constant 0 : index
    %c0_16 = arith.constant 0 : index
    %14 = vector.load %arg12[%c0_15, %c0_16] : memref<16x16xf32, #tpu.memory_space<vmem>>, vector<16x16xf32>
    tpu.vector_store %arg12[%c0_15, %c0_16], %13 {strides = array<i32>} : memref<16x16xf32, #tpu.memory_space<vmem>>, vector<16x16xf32>,
    %c0_i32_17 = arith.constant 0 : i32
    %15 = arith.cmpi eq, %arg1, %c0_i32_17 : i32
    %16 = arith.extui %15 : i1 to i32
    %c0_i32_18 = arith.constant 0 : i32
    %17 = arith.cmpi ne, %16, %c0_i32_18 : i32
    scf.if %17 {
      %c0_19 = arith.constant 0 : index
      %c0_20 = arith.constant 0 : index
      %18 = vector.load %arg11[%c0_19, %c0_20] : memref<16x128xf32, #tpu.memory_space<vmem>>, vector<16x128xf32>
      %c0_21 = arith.constant 0 : index
      %c0_22 = arith.constant 0 : index
      %19 = vector.load %arg12[%c0_21, %c0_22] : memref<16x16xf32, #tpu.memory_space<vmem>>, vector<16x16xf32>
      %c0_23 = arith.constant 0 : index
      %c0_24 = arith.constant 0 : index
      %20 = vector.load %arg9[%c0_23, %c0_24] : memref<128x16xf32, #tpu.memory_space<vmem>>, vector<128x16xf32>
      %cst_25 = arith.constant dense<0.000000e+00> : vector<16x128xf32>
      %21 = tpu.matmul %19, %20, %cst_25 {dimension_numbers = #tpu.dot_dimension_numbers<[1], [1], [0], [0], [0, 0, 1, 0], [], []>} : vector<16x16xf32>, vector<128x16xf32>, vector<16x128xf32> -> vector<16x128xf32>
      %22 = arith.subf %18, %21 : vector<16x128xf32>
      %c0_26 = arith.constant 0 : index
      %c0_27 = arith.constant 0 : index
      %23 = vector.load %arg11[%c0_26, %c0_27] : memref<16x128xf32, #tpu.memory_space<vmem>>, vector<16x128xf32>
      tpu.vector_store %arg11[%c0_26, %c0_27], %22 {strides = array<i32>} : memref<16x128xf32, #tpu.memory_space<vmem>>, vector<16x128xf32>,
    } else {
    }
    return
  }
  func.func @transform_0(%arg0: i32, %arg1: i32) -> (i32, i32) {
    %c0_i32 = arith.constant 0 : i32
    %c0_i32_0 = arith.constant 0 : i32
    %c0_i32_1 = arith.constant 0 : i32
    return %c0_i32, %c0_i32_0 : i32, i32
  }
  func.func @transform_1(%arg0: i32, %arg1: i32) -> (i32, i32) {
    %c0_i32 = arith.constant 0 : i32
    %c0_i32_0 = arith.constant 0 : i32
    return %c0_i32, %arg1 : i32, i32
  }
  func.func @transform_2(%arg0: i32, %arg1: i32) -> (i32, i32) {
    %c0_i32 = arith.constant 0 : i32
    %c0_i32_0 = arith.constant 0 : i32
    return %arg0, %c0_i32 : i32, i32
  }
  func.func @transform_3(%arg0: i32, %arg1: i32) -> (i32, i32) {
    %c0_i32 = arith.constant 0 : i32
    %c0_i32_0 = arith.constant 0 : i32
    %c0_i32_1 = arith.constant 0 : i32
    return %c0_i32, %c0_i32_0 : i32, i32
  }
  func.func @transform_4(%arg0: i32, %arg1: i32) -> (i32, i32) {
    %c0_i32 = arith.constant 0 : i32
    %c0_i32_0 = arith.constant 0 : i32
    return %arg0, %c0_i32 : i32, i32
  }
  func.func @transform_5(%arg0: i32, %arg1: i32) -> (i32, i32) {
    %c0_i32 = arith.constant 0 : i32
    return %arg0, %arg1 : i32, i32
  }
  func.func @transform_6(%arg0: i32, %arg1: i32) -> (i32, i32) {
    %c0_i32 = arith.constant 0 : i32
    %c0_i32_0 = arith.constant 0 : i32
    return %c0_i32, %arg1 : i32, i32
  }
  func.func @transform_7(%arg0: i32, %arg1: i32) -> (i32, i32) {
    %c0_i32 = arith.constant 0 : i32
    %c0_i32_0 = arith.constant 0 : i32
    return %arg0, %c0_i32 : i32, i32
  }
  func.func @transform_8(%arg0: i32, %arg1: i32) -> (i32, i32) {
    %c0_i32 = arith.constant 0 : i32
    %c0_i32_0 = arith.constant 0 : i32
    return %c0_i32, %arg0 : i32, i32
  }
  func.func @transform_9(%arg0: i32, %arg1: i32) -> (i32, i32) {
    %c0_i32 = arith.constant 0 : i32
    %c0_i32_0 = arith.constant 0 : i32
    return %c0_i32, %arg0 : i32, i32
  }
}

</mosaic_0001>

<bundles_post_ra>
// kernel: tpu_custom_call.1
= control target key start
LH: loop header
LB: loop body
LE: loop exit
PB: predicated region body
PF: predicated region fallthrough
CT: control target
= control target key end

     0   :  { %vm162_vm0 = vcmask 130048   ;;  %s938_s0 = inlined_call_operand.vmem [shape: bf16[16,128], index: 0, kind: input, shape index: {}]   ;;  %s939_s1 = inlined_call_operand.vmem [shape: bf16[16,128], index: 1, kind: input, shape index: {}]   ;;  %s940_s2 = inlined_call_operand.vmem [shape: bf16[128,128], index: 2, kind: input, shape index: {}]   ;;  %s941_s3 = inlined_call_operand.vmem [shape: bf16[16,128], index: 3, kind: input, shape index: {}]   ;;  %s942_s4 = inlined_call_operand.vmem [shape: f32[128,16], index: 4, kind: input, shape index: {}]   ;;  %s943_s5 = inlined_call_operand.vmem [shape: bf16[128,128], index: 5, kind: input, shape index: {}]   ;;  %s944_s6 = inlined_call_operand.vmem [shape: bf16[16,128], index: 6, kind: input, shape index: {}]   ;;  %s945_s7 = inlined_call_operand.vmem [shape: f32[128,16], index: 7, kind: input, shape index: {}]   ;;  %s946_s8 = inlined_call_operand.vmem [shape: f32[1,128], index: 8, kind: input, shape index: {}]   ;;  %s947_s9 = inlined_call_operand.hbm [shape: f32[16,128], index: 9, kind: output, shape index: {}]  }
   0x1   :  { %v632_v0 = vld [vmem:[%s941_s3] sm:$0xff]  ;;  %v631_v2 = vld [vmem:[%s940_s2 + $0x38] sm:$0xff]  ;;  %v160_v5 = vld [vmem:[%s942_s4 + $0x70] sm:$0xff] }
   0x2   :  { %v643_v1 = vld [vmem:[%s944_s6] sm:$0xff]  ;;  %v161_v3 = vld [vmem:[%s942_s4 + $0x78] sm:$0xff]  ;;  %139 = vmatpush.bf16.xpose.msra.mxu2 %v632_v0  ;;  %110 = vmatpush.bf16.xpose.msra.mxu0 %v631_v2  ;;  %v630_v9 = vld [vmem:[%s940_s2 + $0x30] sm:$0xff] }
   0x3   :  { %369 = vmatpush.bf16.xpose.msra.mxu1 %v643_v1  ;;  %v641_v4 = vld [vmem:[%s943_s5 + $0x38] sm:$0xff]  ;;  %v751_v6 = vld [vmem:[%s938_s0] sm:$0xff]  ;;  %v402_v10 = vld [vmem:[%s945_s7 + $0x70] sm:$0xff] }
   0x4   :  { %326 = vmatpush.bf16.xpose.msra.mxu3 %v641_v4  ;;  %v642_v7 = vld [vmem:[%s939_s1] sm:$0xff]  ;;  %v403_v8 = vld [vmem:[%s945_s7 + $0x78] sm:$0xff]  ;;  %v159_v11 = vld [vmem:[%s942_s4 + $0x68] sm:$0xff] }
   0x5   :  { %v640_v12 = vld [vmem:[%s943_s5 + $0x30] sm:$0xff] }
   0x9   :  { %140 = vmatmul.bf16.vlgmr.msra.gmra.mxu2 %v751_v6 }
   0xa   :  { %543 = vmatpush.xpose.msk.msrb.mxu2 %vm162_vm0, %v161_v3  ;;  %370 = vmatmul.bf16.vlgmr.msra.gmra.mxu1 %v642_v7 }
   0xb   :  { %605 = vmatpush.xpose.msk.msrb.mxu1 %vm162_vm0, %v403_v8 }
   0xe   :  { %544 = vmatpush.xpose.msk.msrb.mxu2 %vm162_vm0, %v160_v5 }
   0xf   :  { %606 = vmatpush.xpose.msk.msrb.mxu1 %vm162_vm0, %v402_v10 }
  0x10   :  { %14 = vsyncpa [#allocation4], 0  ;;  %111 = vmatpush.bf16.xpose.msra.mxu0 %v630_v9  ;;  %v401_v13 = vld [vmem:[%s945_s7 + $0x68] sm:$0xff]  ;;  %v158_v14 = vld [vmem:[%s942_s4 + $0x60] sm:$0xff]  ;;  %327 = vmatpush.bf16.xpose.msra.mxu3 %v640_v12  ;;  %v675_v48 = vmov 0.0   ;;  %s676_s16 = smov [#allocation3]  }
  0x11   :  { %v629_v15 = vld [vmem:[%s940_s2 + $0x28] sm:$0xff]  ;;  %v400_v16 = vld [vmem:[%s945_s7 + $0x60] sm:$0xff]  ;;  %v157_v17 = vld [vmem:[%s942_s4 + $0x58] sm:$0xff]  ;;  %250 = vst.msk [vmem:[#allocation2] sm:$0xff] %vm162_vm0, %v675_v48  ;;  %s489_s17 = sshll.u32 %s676_s16, 4  ;;  %s491_s6 = sshll.u32 %s947_s9, 4  ;;  %s490_s17 = int_to_ptr.vmem [resolvable:$true] %s489_s17  ;;  %s492_s6 = int_to_ptr.hbm [resolvable:$true] %s491_s6 }
  0x12   :  { %545 = vmatpush.xpose.msk.msrb.mxu2 %vm162_vm0, %v159_v11  ;;  %v639_v18 = vld [vmem:[%s943_s5 + $0x28] sm:$0xff]  ;;  %v399_v19 = vld [vmem:[%s945_s7 + $0x58] sm:$0xff]  ;;  %v156_v20 = vld [vmem:[%s942_s4 + $0x50] sm:$0xff]  ;;  %251 = vst.msk [vmem:[#allocation2 + $0x8] sm:$0xff] %vm162_vm0, %v675_v48  ;;  %s678_s19 = smov 8  }
  0x13   :  { %607 = vmatpush.xpose.msk.msrb.mxu1 %vm162_vm0, %v401_v13  ;;  %v628_v21 = vld [vmem:[%s940_s2 + $0x20] sm:$0xff]  ;;  %v398_v22 = vld [vmem:[%s945_s7 + $0x50] sm:$0xff]  ;;  %v155_v23 = vld [vmem:[%s942_s4 + $0x48] sm:$0xff] }
  0x14   :  { %v638_v24 = vld [vmem:[%s943_s5 + $0x20] sm:$0xff]  ;;  %v397_v25 = vld [vmem:[%s945_s7 + $0x48] sm:$0xff]  ;;  %v627_v27 = vld [vmem:[%s940_s2 + $0x18] sm:$0xff] }
  0x15   :  { %v154_v26 = vld [vmem:[%s942_s4 + $0x40] sm:$0xff]  ;;  %v153_v29 = vld [vmem:[%s942_s4 + $0x38] sm:$0xff]  ;;  %v152_v32 = vld [vmem:[%s942_s4 + $0x30] sm:$0xff] }
  0x16   :  { %546 = vmatpush.xpose.msk.msrb.mxu2 %vm162_vm0, %v158_v14  ;;  %v396_v28 = vld [vmem:[%s945_s7 + $0x40] sm:$0xff]  ;;  %v637_v30 = vld [vmem:[%s943_s5 + $0x18] sm:$0xff]  ;;  %v626_v33 = vld [vmem:[%s940_s2 + $0x10] sm:$0xff] }
  0x17   :  { %608 = vmatpush.xpose.msk.msrb.mxu1 %vm162_vm0, %v400_v16  ;;  %v395_v31 = vld [vmem:[%s945_s7 + $0x38] sm:$0xff]  ;;  %v394_v34 = vld [vmem:[%s945_s7 + $0x30] sm:$0xff]  ;;  %v151_v35 = vld [vmem:[%s942_s4 + $0x28] sm:$0xff] }
  0x18   :  { %112 = vmatpush.bf16.xpose.msra.mxu0 %v629_v15  ;;  %328 = vmatpush.bf16.xpose.msra.mxu3 %v639_v18  ;;  %v636_v36 = vld [vmem:[%s943_s5 + $0x10] sm:$0xff]  ;;  %v393_v37 = vld [vmem:[%s945_s7 + $0x28] sm:$0xff]  ;;  %v150_v38 = vld [vmem:[%s942_s4 + $0x20] sm:$0xff] }
  0x19   :  { %v625_v39 = vld [vmem:[%s940_s2 + $0x8] sm:$0xff]  ;;  %v149_v40 = vld [vmem:[%s942_s4 + $0x18] sm:$0xff]  ;;  %v148_v42 = vld [vmem:[%s942_s4 + $0x10] sm:$0xff] }
  0x1a   :  { %547 = vmatpush.xpose.msk.msrb.mxu2 %vm162_vm0, %v157_v17  ;;  %v635_v41 = vld [vmem:[%s943_s5 + $0x8] sm:$0xff]  ;;  %v624_v43 = vld [vmem:[%s940_s2] sm:$0xff]  ;;  %v391_v49 = vld [vmem:[%s945_s7 + $0x18] sm:$0xff] }
  0x1b   :  { %609 = vmatpush.xpose.msk.msrb.mxu1 %vm162_vm0, %v399_v19  ;;  %v147_v44 = vld [vmem:[%s942_s4 + $0x8] sm:$0xff]  ;;  %v634_v45 = vld [vmem:[%s943_s5] sm:$0xff]  ;;  %v390_v50 = vld [vmem:[%s945_s7 + $0x10] sm:$0xff] }
  0x1c   :  { %v146_v46 = vld [vmem:[%s942_s4] sm:$0xff]  ;;  %v389_v52 = vld [vmem:[%s945_s7 + $0x8] sm:$0xff] }
  0x1d   :  { %v392_v47 = vld [vmem:[%s945_s7 + $0x20] sm:$0xff]  ;;  %v345_v58 = vld [vmem:[#allocation2 + $0x8] sm:$0xff] }
  0x1e   :  { %548 = vmatpush.xpose.msk.msrb.mxu2 %vm162_vm0, %v156_v20  ;;  %v633_v51 = vld [vmem:[%s939_s1] sm:$0xff] }
  0x1f   :  { %610 = vmatpush.xpose.msk.msrb.mxu1 %vm162_vm0, %v398_v22  ;;  %v388_v53 = vld [vmem:[%s945_s7] sm:$0xff] }
  0x20   :  { %113 = vmatpush.bf16.xpose.msra.mxu0 %v628_v21  ;;  %329 = vmatpush.bf16.xpose.msra.mxu3 %v638_v24  ;;  %v344_v54 = vld [vmem:[#allocation2] sm:$0xff] }
  0x21   :  { %v648_v1 = vld [vmem:[%s946_s8] ss:$0 sm:$0xff]  ;;  %s677_s8 = smov 128  }
  0x22   :  { %549 = vmatpush.xpose.msk.msrb.mxu2 %vm162_vm0, %v155_v23 }
  0x23   :  { %611 = vmatpush.xpose.msk.msrb.mxu1 %vm162_vm0, %v397_v25 }
  0x26   :  { %550 = vmatpush.xpose.msk.msrb.mxu2 %vm162_vm0, %v154_v26 }
  0x27   :  { %612 = vmatpush.xpose.msk.msrb.mxu1 %vm162_vm0, %v396_v28 }
  0x28   :  { %114 = vmatpush.bf16.xpose.msra.mxu0 %v627_v27  ;;  %330 = vmatpush.bf16.xpose.msra.mxu3 %v637_v30 }
  0x2a   :  { %551 = vmatpush.xpose.msk.msrb.mxu2 %vm162_vm0, %v153_v29 }
  0x2b   :  { %613 = vmatpush.xpose.msk.msrb.mxu1 %vm162_vm0, %v395_v31 }
  0x2e   :  { %552 = vmatpush.xpose.msk.msrb.mxu2 %vm162_vm0, %v152_v32 }
  0x2f   :  { %614 = vmatpush.xpose.msk.msrb.mxu1 %vm162_vm0, %v394_v34 }
  0x30   :  { %115 = vmatpush.bf16.xpose.msra.mxu0 %v626_v33  ;;  %331 = vmatpush.bf16.xpose.msra.mxu3 %v636_v36 }
  0x32   :  { %553 = vmatpush.xpose.msk.msrb.mxu2 %vm162_vm0, %v151_v35 }
  0x33   :  { %615 = vmatpush.xpose.msk.msrb.mxu1 %vm162_vm0, %v393_v37 }
  0x36   :  { %554 = vmatpush.xpose.msk.msrb.mxu2 %vm162_vm0, %v150_v38 }
  0x37   :  { %616 = vmatpush.xpose.msk.msrb.mxu1 %vm162_vm0, %v392_v47 }
  0x38   :  { %116 = vmatpush.bf16.xpose.msra.mxu0 %v625_v39  ;;  %332 = vmatpush.bf16.xpose.msra.mxu3 %v635_v41 }
  0x3a   :  { %555 = vmatpush.xpose.msk.msrb.mxu2 %vm162_vm0, %v149_v40 }
  0x3b   :  { %617 = vmatpush.xpose.msk.msrb.mxu1 %vm162_vm0, %v391_v49 }
  0x3e   :  { %556 = vmatpush.xpose.msk.msrb.mxu2 %vm162_vm0, %v148_v42 }
  0x3f   :  { %618 = vmatpush.xpose.msk.msrb.mxu1 %vm162_vm0, %v390_v50 }
  0x40   :  { %117 = vmatpush.bf16.xpose.msra.mxu0 %v624_v43  ;;  %333 = vmatpush.bf16.xpose.msra.mxu3 %v634_v45 }
  0x42   :  { %557 = vmatpush.xpose.msk.msrb.mxu2 %vm162_vm0, %v147_v44 }
  0x43   :  { %619 = vmatpush.xpose.msk.msrb.mxu1 %vm162_vm0, %v389_v52 }
  0x46   :  { %558 = vmatpush.xpose.msk.msrb.mxu2 %vm162_vm0, %v146_v46 }
  0x47   :  { %118 = vmatmul.bf16.vlgmr.msra.gmra.mxu0 %v751_v6  ;;  %334 = vmatmul.bf16.vlgmr.msra.gmra.mxu3 %v633_v51 }
  0x48   :  { %620 = vmatpush.xpose.msk.msrb.mxu1 %vm162_vm0, %v388_v53 }
  0x87   :  { %v371_v55 = vpop.f32.mrf.mxu1 }
  0x88   :  { %v376_v56 = vadd.f32 %v371_v55, %v344_v54 }
  0x8a   :  { %379 = vst.msk [vmem:[#allocation2] sm:$0xff] %vm162_vm0, %v376_v56 }
  0x8c   :  { %v141_v57 = vpop.f32.mrf.mxu2 }
  0x8d   :  { %559 = vmatmul.msk.f32.vlgmr.msrb.gmra.mxu2 %vm162_vm0, %v141_v57 }
  0x8f   :  { %v373_v59 = vpop.f32.mrf.mxu1 }
  0x90   :  { %v377_v60 = vadd.f32 %v373_v59, %v345_v58 }
  0x91   :  { %v386_v61 = vld [vmem:[#allocation2] sm:$0xff] }
  0x92   :  { %380 = vst.msk [vmem:[#allocation2 + $0x8] sm:$0xff] %vm162_vm0, %v377_v60  ;;  %621 = vmatmul.msk.f32.vlgmr.msrb.gmra.mxu1 %vm162_vm0, %v386_v61 }
  0x94   :  { %v143_v62 = vpop.f32.mrf.mxu2 }
  0x95   :  { %560 = vmatmul.msk.f32.gmra.mxu2 %vm162_vm0, %v143_v62 }
  0x99   :  { %v387_v63 = vld [vmem:[#allocation2 + $0x8] sm:$0xff] }
  0x9a   :  { %622 = vmatmul.msk.f32.gmra.mxu1 %vm162_vm0, %v387_v63 }
  0xc4   :  { %v119_v0 = vpop.f32.mrf.mxu0 }
  0xca   :  { %v335_v4 = vpop.f32.mrf.mxu3 }
  0xcc   :  { %v121_v9 = vpop.f32.mrf.mxu0 }
  0xd2   :  { %v337_v13 = vpop.f32.mrf.mxu3 }
 0x10f   :  { %v475_v6 = vpop.f32.mrf.mxu1 }
 0x110   :  { %v234_v2 = vpop.f32.mrf.mxu2 }
 0x111   :  { %v240_v3 = vsub.f32 %v119_v0, %v234_v2 }
 0x113   :  { %v246_v5 = vadd.f32 %v648_v1, %v240_v3 }
 0x115   :  { %v340_v7 = vadd.f32 %v335_v4, %v246_v5 }
 0x117   :  { %v481_v8 = vsub.f32 %v340_v7, %v475_v6  ;;  %v478_v15 = vpop.f32.mrf.mxu1 }
 0x118   :  { %v237_v10 = vpop.f32.mrf.mxu2 }
 0x119   :  { %v241_v11 = vsub.f32 %v121_v9, %v237_v10  ;;  %483 = vst [vmem:[#allocation3] sm:$0xff] %v481_v8 }
 0x11b   :  { %v247_v12 = vadd.f32 %v648_v1, %v241_v11 }
 0x11d   :  { %v341_v14 = vadd.f32 %v337_v13, %v247_v12 }
 0x11f   :  { %v482_v16 = vsub.f32 %v341_v14, %v478_v15 }
 0x121   :  { %484 = vst [vmem:[#allocation3 + $0x8] sm:$0xff] %v482_v16 }
 0x122   :  { %497 = dma.vmem_to_hbm [thread:$0]  %s490_s17, 256, %s492_s6, [#allocation4], %s677_s8, %s677_s8, %s678_s19  }
 0x123   :  { %673 = dma.done.wait [#allocation4], 256  }
 0x124   :  { %674 = vsyncadd [#allocation4], 4294967040 }
 0x125   :  { %502 = vsyncpa [#allocation4], 1 }

</bundles_post_ra>
